<compile_context>
chip_gen: v7x
topology: tpu7x:2x2x1
jax: 0.10.0
libtpu: 0.0.40
codegen_flags: <defaults>
</compile_context>

<pallas_src>
import functools

import jax
import jax.numpy as jnp
from jax.experimental import pallas as pl
from jax.experimental.pallas import tpu as pltpu


def _basic_block_kernel(x_ref, wp_ref, o_ref, xp2_ref, *, n_adj, dilation, eps):
    # x_ref:   (B, Cin, L)        NCL input (Cin on sublanes, L on lanes)
    # wp_ref:  (Cout, K*Cin + 3)  packed [W2 | conv_bias | bn_gamma | bn_beta]
    # o_ref:   (B, Cout, L)       NCL output
    # xp2_ref: (B, Cin, 2*L)      VMEM scratch: periodic extension of x along L
    B, Cin, L = x_ref.shape
    Cout = o_ref.shape[1]
    K = 2 * n_adj + 1
    KC = K * Cin
    pad = n_adj * dilation

    w2 = wp_ref[:, 0:KC]                  # (Cout, K*Cin), tap-major / channel-minor
    bias = wp_ref[:, KC:KC + 1]           # (Cout, 1)
    gamma = wp_ref[:, KC + 1:KC + 2]      # (Cout, 1)
    beta = wp_ref[:, KC + 2:KC + 3]       # (Cout, 1)

    # Periodic extension: xp2[b, c, j] = x[b, c, j % L] for j in [0, 2L).
    x = x_ref[...]
    xp2_ref[:, :, 0:L] = x
    xp2_ref[:, :, L:2 * L] = x

    # Pass 1: circular conv as ONE matmul per batch, + bias + ReLU.
    # Raw activations go straight to o_ref; per-channel sum / sum-of-squares are
    # accumulated for the BatchNorm statistics (avoids holding all y in vregs).
    s1 = jnp.zeros((Cout, 1), jnp.float32)
    s2 = jnp.zeros((Cout, 1), jnp.float32)
    for b in range(B):                                   # B static & small -> unrolled
        taps = []
        for k in range(K):
            s = (k * dilation - pad) % L                 # static window start in [0, L)
            taps.append(xp2_ref[b, :, s:s + L])          # (Cin, L) shifted view
        slab = jnp.concatenate(taps, axis=0)             # (K*Cin, L), sublane-aligned stack
        yb = jnp.dot(w2, slab, preferred_element_type=jnp.float32)  # (Cout, L)
        yb = jnp.maximum(yb + bias, 0.0)                 # conv bias + ReLU
        o_ref[b] = yb                                    # lane-dense (Cout, L) store
        s1 = s1 + jnp.sum(yb, axis=1, keepdims=True)
        s2 = s2 + jnp.sum(yb * yb, axis=1, keepdims=True)

    # BatchNorm1d, training-mode forward: biased batch variance over (B, L).
    inv_n = 1.0 / float(B * L)
    mean = s1 * inv_n
    var = s2 * inv_n - mean * mean                       # one-pass variance (f32, post-ReLU)
    scale = gamma * jax.lax.rsqrt(var + eps)             # (Cout, 1)
    shift = beta - mean * scale                          # (Cout, 1)

    # Pass 2: normalize in place with lane-dense (Cout, L) loads/stores.
    for b in range(B):
        o_ref[b] = o_ref[b] * scale + shift


def basic_block(x_ncl, conv_weight, conv_bias, bn_gamma, bn_beta,
                *, n_adj=4, dilation=1, eps=1e-5):
    """x_ncl: (B, Cin, L) float32 (PyTorch NCL). Returns (B, Cout, L) NCL."""
    B, Cin, L = x_ncl.shape
    Cout, Cin_w, K = conv_weight.shape
    assert K == 2 * n_adj + 1 and Cin_w == Cin
    assert n_adj * dilation <= L, "circular pad must not exceed one period"

    # Pack [W2 | bias | gamma | beta] into a single (Cout, K*Cin + 3) array
    # (one DMA). W2[co, k*Cin + ci] = conv_weight[co, ci, k] to match the slab.
    w2 = jnp.transpose(conv_weight, (0, 2, 1)).reshape(Cout, K * Cin)
    wp = jnp.concatenate(
        [w2,
         conv_bias.reshape(Cout, 1),
         bn_gamma.reshape(Cout, 1),
         bn_beta.reshape(Cout, 1)], axis=1).astype(jnp.float32)

    kern = functools.partial(_basic_block_kernel,
                             n_adj=n_adj, dilation=dilation, eps=eps)
    vmem = pl.BlockSpec(memory_space=pltpu.MemorySpace.VMEM)
    return pl.pallas_call(
        kern,
        out_shape=jax.ShapeDtypeStruct((B, Cout, L), jnp.float32),
        in_specs=[vmem, vmem],
        out_specs=vmem,
        scratch_shapes=[pltpu.VMEM((B, Cin, 2 * L), jnp.float32)],
    )(x_ncl.astype(jnp.float32), wp)


def _reference(x_ncl, w, b, gamma, beta, *, n_adj, dilation, eps=1e-5):
    """Pure-JAX reference mirroring the PyTorch forward (training-mode BN)."""
    pad = n_adj * dilation
    xp = jnp.concatenate([x_ncl[..., -pad:], x_ncl, x_ncl[..., :pad]], axis=2)
    y = jax.lax.conv_general_dilated(
        xp, w, window_strides=(1,), padding="VALID",
        rhs_dilation=(dilation,),
        dimension_numbers=("NCH", "OIH", "NCH"))
    y = y + b[None, :, None]
    y = jnp.maximum(y, 0.0)
    mean = jnp.mean(y, axis=(0, 2), keepdims=True)
    var = jnp.mean((y - mean) ** 2, axis=(0, 2), keepdims=True)
    y = (y - mean) * jax.lax.rsqrt(var + eps)
    return gamma[None, :, None] * y + beta[None, :, None]


if __name__ == "__main__":
    # BasicBlock(state_dim=8, out_state_dim=8, conv_type='grid', n_adj=4)
    B, Cin, Cout, L = 2, 8, 8, 40
    n_adj, dilation = 4, 1          # conv_type='grid' -> CircConv (dilation fixed to 1)
    K = 2 * n_adj + 1

    key = jax.random.PRNGKey(0)
    kx, kw, kb, kg, kbt = jax.random.split(key, 5)
    x = jax.random.normal(kx, (B, Cin, L), dtype=jnp.float32)
    conv_weight = 0.1 * jax.random.normal(kw, (Cout, Cin, K), dtype=jnp.float32)
    conv_bias = 0.1 * jax.random.normal(kb, (Cout,), dtype=jnp.float32)
    bn_gamma = 1.0 + 0.1 * jax.random.normal(kg, (Cout,), dtype=jnp.float32)
    bn_beta = 0.1 * jax.random.normal(kbt, (Cout,), dtype=jnp.float32)

    out = basic_block(x, conv_weight, conv_bias, bn_gamma, bn_beta,
                      n_adj=n_adj, dilation=dilation)
    out = jax.block_until_ready(out)

    ref = _reference(x, conv_weight, conv_bias, bn_gamma, bn_beta,
                     n_adj=n_adj, dilation=dilation)
    assert out.shape == (B, Cout, L)
    assert jnp.allclose(out, ref, atol=1e-4, rtol=1e-4), "mismatch vs reference"

    print("KERNEL_OK")
</pallas_src>

<mosaic_0001>
module attributes {stable_mosaic.version = 11 : i64} {
  func.func @_basic_block_kernel(%arg0: memref<2x8x40xf32, #tpu.memory_space<vmem>>, %arg1: memref<8x75xf32, #tpu.memory_space<vmem>>, %arg2: memref<2x8x40xf32, #tpu.memory_space<vmem>>, %arg3: memref<2x8x80xf32, #tpu.memory_space<vmem>>) attributes {dimension_semantics = [], scalar_prefetch = 0 : i64, scratch_operands = 1 : i64, tpu.core_type = #tpu.core_type<tc>} {
    %c0 = arith.constant 0 : index
    %c0_0 = arith.constant 0 : index
    %0 = vector.load %arg1[%c0, %c0_0] : memref<8x75xf32, #tpu.memory_space<vmem>>, vector<8x72xf32>
    %c0_1 = arith.constant 0 : index
    %c72 = arith.constant 72 : index
    %1 = vector.load %arg1[%c0_1, %c72] : memref<8x75xf32, #tpu.memory_space<vmem>>, vector<8x1xf32>
    %c0_2 = arith.constant 0 : index
    %c73 = arith.constant 73 : index
    %2 = vector.load %arg1[%c0_2, %c73] : memref<8x75xf32, #tpu.memory_space<vmem>>, vector<8x1xf32>
    %c0_3 = arith.constant 0 : index
    %c74 = arith.constant 74 : index
    %3 = vector.load %arg1[%c0_3, %c74] : memref<8x75xf32, #tpu.memory_space<vmem>>, vector<8x1xf32>
    %c0_4 = arith.constant 0 : index
    %c0_5 = arith.constant 0 : index
    %c0_6 = arith.constant 0 : index
    %4 = vector.load %arg0[%c0_4, %c0_5, %c0_6] : memref<2x8x40xf32, #tpu.memory_space<vmem>>, vector<2x8x40xf32>
    %c0_7 = arith.constant 0 : index
    %c0_8 = arith.constant 0 : index
    %c0_9 = arith.constant 0 : index
    %5 = vector.load %arg3[%c0_7, %c0_8, %c0_9] : memref<2x8x80xf32, #tpu.memory_space<vmem>>, vector<2x8x40xf32>
    tpu.vector_store %arg3[%c0_7, %c0_8, %c0_9], %4 {strides = array<i32>} : memref<2x8x80xf32, #tpu.memory_space<vmem>>, vector<2x8x40xf32>,
    %c0_10 = arith.constant 0 : index
    %c0_11 = arith.constant 0 : index
    %c40 = arith.constant 40 : index
    %6 = vector.load %arg3[%c0_10, %c0_11, %c40] : memref<2x8x80xf32, #tpu.memory_space<vmem>>, vector<2x8x40xf32>
    tpu.vector_store %arg3[%c0_10, %c0_11, %c40], %4 {strides = array<i32>} : memref<2x8x80xf32, #tpu.memory_space<vmem>>, vector<2x8x40xf32>,
    %cst = arith.constant 0.000000e+00 : f32
    %7 = vector.broadcast %cst : f32 to vector<8x1xf32>
    %cst_12 = arith.constant 0.000000e+00 : f32
    %8 = vector.broadcast %cst_12 : f32 to vector<8x1xf32>
    %c0_13 = arith.constant 0 : index
    %c0_14 = arith.constant 0 : index
    %c36 = arith.constant 36 : index
    %9 = vector.load %arg3[%c0_13, %c0_14, %c36] : memref<2x8x80xf32, #tpu.memory_space<vmem>>, vector<1x8x40xf32>
    %10 = vector.shape_cast %9 : vector<1x8x40xf32> to vector<8x40xf32>
    %c0_15 = arith.constant 0 : index
    %c0_16 = arith.constant 0 : index
    %c37 = arith.constant 37 : index
    %11 = vector.load %arg3[%c0_15, %c0_16, %c37] : memref<2x8x80xf32, #tpu.memory_space<vmem>>, vector<1x8x40xf32>
    %12 = vector.shape_cast %11 : vector<1x8x40xf32> to vector<8x40xf32>
    %c0_17 = arith.constant 0 : index
    %c0_18 = arith.constant 0 : index
    %c38 = arith.constant 38 : index
    %13 = vector.load %arg3[%c0_17, %c0_18, %c38] : memref<2x8x80xf32, #tpu.memory_space<vmem>>, vector<1x8x40xf32>
    %14 = vector.shape_cast %13 : vector<1x8x40xf32> to vector<8x40xf32>
    %c0_19 = arith.constant 0 : index
    %c0_20 = arith.constant 0 : index
    %c39 = arith.constant 39 : index
    %15 = vector.load %arg3[%c0_19, %c0_20, %c39] : memref<2x8x80xf32, #tpu.memory_space<vmem>>, vector<1x8x40xf32>
    %16 = vector.shape_cast %15 : vector<1x8x40xf32> to vector<8x40xf32>
    %c0_21 = arith.constant 0 : index
    %c0_22 = arith.constant 0 : index
    %c0_23 = arith.constant 0 : index
    %17 = vector.load %arg3[%c0_21, %c0_22, %c0_23] : memref<2x8x80xf32, #tpu.memory_space<vmem>>, vector<1x8x40xf32>
    %18 = vector.shape_cast %17 : vector<1x8x40xf32> to vector<8x40xf32>
    %c0_24 = arith.constant 0 : index
    %c0_25 = arith.constant 0 : index
    %c1 = arith.constant 1 : index
    %19 = vector.load %arg3[%c0_24, %c0_25, %c1] : memref<2x8x80xf32, #tpu.memory_space<vmem>>, vector<1x8x40xf32>
    %20 = vector.shape_cast %19 : vector<1x8x40xf32> to vector<8x40xf32>
    %c0_26 = arith.constant 0 : index
    %c0_27 = arith.constant 0 : index
    %c2 = arith.constant 2 : index
    %21 = vector.load %arg3[%c0_26, %c0_27, %c2] : memref<2x8x80xf32, #tpu.memory_space<vmem>>, vector<1x8x40xf32>
    %22 = vector.shape_cast %21 : vector<1x8x40xf32> to vector<8x40xf32>
    %c0_28 = arith.constant 0 : index
    %c0_29 = arith.constant 0 : index
    %c3 = arith.constant 3 : index
    %23 = vector.load %arg3[%c0_28, %c0_29, %c3] : memref<2x8x80xf32, #tpu.memory_space<vmem>>, vector<1x8x40xf32>
    %24 = vector.shape_cast %23 : vector<1x8x40xf32> to vector<8x40xf32>
    %c0_30 = arith.constant 0 : index
    %c0_31 = arith.constant 0 : index
    %c4 = arith.constant 4 : index
    %25 = vector.load %arg3[%c0_30, %c0_31, %c4] : memref<2x8x80xf32, #tpu.memory_space<vmem>>, vector<1x8x40xf32>
    %26 = vector.shape_cast %25 : vector<1x8x40xf32> to vector<8x40xf32>
    %27 = tpu.concatenate %10, %12, %14, %16, %18, %20, %22, %24, %26 in 0 : vector<8x40xf32>, vector<8x40xf32>, vector<8x40xf32>, vector<8x40xf32>, vector<8x40xf32>, vector<8x40xf32>, vector<8x40xf32>, vector<8x40xf32>, vector<8x40xf32> -> vector<72x40xf32>
    %cst_32 = arith.constant dense<0.000000e+00> : vector<8x40xf32>
    %28 = tpu.matmul %0, %27, %cst_32 {dimension_numbers = #tpu.dot_dimension_numbers<[1], [0], [0], [1], [0, 0, 1, 1], [], []>} : vector<8x72xf32>, vector<72x40xf32>, vector<8x40xf32> -> vector<8x40xf32>
    %29 = vector.broadcast %1 : vector<8x1xf32> to vector<8x40xf32>
    %30 = arith.addf %28, %29 : vector<8x40xf32>
    %cst_33 = arith.constant 0.000000e+00 : f32
    %31 = vector.broadcast %cst_33 : f32 to vector<8x40xf32>
    %32 = arith.maximumf %30, %31 : vector<8x40xf32>
    %c0_34 = arith.constant 0 : index
    %c0_35 = arith.constant 0 : index
    %c0_36 = arith.constant 0 : index
    %33 = vector.load %arg2[%c0_34, %c0_35, %c0_36] : memref<2x8x40xf32, #tpu.memory_space<vmem>>, vector<1x8x40xf32>
    %34 = vector.shape_cast %33 : vector<1x8x40xf32> to vector<8x40xf32>
    %35 = vector.shape_cast %32 : vector<8x40xf32> to vector<1x8x40xf32>
    tpu.vector_store %arg2[%c0_34, %c0_35, %c0_36], %35 {strides = array<i32>} : memref<2x8x40xf32, #tpu.memory_space<vmem>>, vector<1x8x40xf32>,
    %cst_37 = arith.constant dense<0.000000e+00> : vector<8xf32>
    %36 = vector.multi_reduction <add>, %32, %cst_37 [1] : vector<8x40xf32> to vector<8xf32>
    %37 = vector.shape_cast %36 : vector<8xf32> to vector<8x1xf32>
    %38 = arith.addf %7, %37 : vector<8x1xf32>
    %39 = arith.mulf %32, %32 : vector<8x40xf32>
    %cst_38 = arith.constant dense<0.000000e+00> : vector<8xf32>
    %40 = vector.multi_reduction <add>, %39, %cst_38 [1] : vector<8x40xf32> to vector<8xf32>
    %41 = vector.shape_cast %40 : vector<8xf32> to vector<8x1xf32>
    %42 = arith.addf %8, %41 : vector<8x1xf32>
    %c1_39 = arith.constant 1 : index
    %c0_40 = arith.constant 0 : index
    %c36_41 = arith.constant 36 : index
    %43 = vector.load %arg3[%c1_39, %c0_40, %c36_41] : memref<2x8x80xf32, #tpu.memory_space<vmem>>, vector<1x8x40xf32>
    %44 = vector.shape_cast %43 : vector<1x8x40xf32> to vector<8x40xf32>
    %c1_42 = arith.constant 1 : index
    %c0_43 = arith.constant 0 : index
    %c37_44 = arith.constant 37 : index
    %45 = vector.load %arg3[%c1_42, %c0_43, %c37_44] : memref<2x8x80xf32, #tpu.memory_space<vmem>>, vector<1x8x40xf32>
    %46 = vector.shape_cast %45 : vector<1x8x40xf32> to vector<8x40xf32>
    %c1_45 = arith.constant 1 : index
    %c0_46 = arith.constant 0 : index
    %c38_47 = arith.constant 38 : index
    %47 = vector.load %arg3[%c1_45, %c0_46, %c38_47] : memref<2x8x80xf32, #tpu.memory_space<vmem>>, vector<1x8x40xf32>
    %48 = vector.shape_cast %47 : vector<1x8x40xf32> to vector<8x40xf32>
    %c1_48 = arith.constant 1 : index
    %c0_49 = arith.constant 0 : index
    %c39_50 = arith.constant 39 : index
    %49 = vector.load %arg3[%c1_48, %c0_49, %c39_50] : memref<2x8x80xf32, #tpu.memory_space<vmem>>, vector<1x8x40xf32>
    %50 = vector.shape_cast %49 : vector<1x8x40xf32> to vector<8x40xf32>
    %c1_51 = arith.constant 1 : index
    %c0_52 = arith.constant 0 : index
    %c0_53 = arith.constant 0 : index
    %51 = vector.load %arg3[%c1_51, %c0_52, %c0_53] : memref<2x8x80xf32, #tpu.memory_space<vmem>>, vector<1x8x40xf32>
    %52 = vector.shape_cast %51 : vector<1x8x40xf32> to vector<8x40xf32>
    %c1_54 = arith.constant 1 : index
    %c0_55 = arith.constant 0 : index
    %c1_56 = arith.constant 1 : index
    %53 = vector.load %arg3[%c1_54, %c0_55, %c1_56] : memref<2x8x80xf32, #tpu.memory_space<vmem>>, vector<1x8x40xf32>
    %54 = vector.shape_cast %53 : vector<1x8x40xf32> to vector<8x40xf32>
    %c1_57 = arith.constant 1 : index
    %c0_58 = arith.constant 0 : index
    %c2_59 = arith.constant 2 : index
    %55 = vector.load %arg3[%c1_57, %c0_58, %c2_59] : memref<2x8x80xf32, #tpu.memory_space<vmem>>, vector<1x8x40xf32>
    %56 = vector.shape_cast %55 : vector<1x8x40xf32> to vector<8x40xf32>
    %c1_60 = arith.constant 1 : index
    %c0_61 = arith.constant 0 : index
    %c3_62 = arith.constant 3 : index
    %57 = vector.load %arg3[%c1_60, %c0_61, %c3_62] : memref<2x8x80xf32, #tpu.memory_space<vmem>>, vector<1x8x40xf32>
    %58 = vector.shape_cast %57 : vector<1x8x40xf32> to vector<8x40xf32>
    %c1_63 = arith.constant 1 : index
    %c0_64 = arith.constant 0 : index
    %c4_65 = arith.constant 4 : index
    %59 = vector.load %arg3[%c1_63, %c0_64, %c4_65] : memref<2x8x80xf32, #tpu.memory_space<vmem>>, vector<1x8x40xf32>
    %60 = vector.shape_cast %59 : vector<1x8x40xf32> to vector<8x40xf32>
    %61 = tpu.concatenate %44, %46, %48, %50, %52, %54, %56, %58, %60 in 0 : vector<8x40xf32>, vector<8x40xf32>, vector<8x40xf32>, vector<8x40xf32>, vector<8x40xf32>, vector<8x40xf32>, vector<8x40xf32>, vector<8x40xf32>, vector<8x40xf32> -> vector<72x40xf32>
    %cst_66 = arith.constant dense<0.000000e+00> : vector<8x40xf32>
    %62 = tpu.matmul %0, %61, %cst_66 {dimension_numbers = #tpu.dot_dimension_numbers<[1], [0], [0], [1], [0, 0, 1, 1], [], []>} : vector<8x72xf32>, vector<72x40xf32>, vector<8x40xf32> -> vector<8x40xf32>
    %63 = vector.broadcast %1 : vector<8x1xf32> to vector<8x40xf32>
    %64 = arith.addf %62, %63 : vector<8x40xf32>
    %cst_67 = arith.constant 0.000000e+00 : f32
    %65 = vector.broadcast %cst_67 : f32 to vector<8x40xf32>
    %66 = arith.maximumf %64, %65 : vector<8x40xf32>
    %c1_68 = arith.constant 1 : index
    %c0_69 = arith.constant 0 : index
    %c0_70 = arith.constant 0 : index
    %67 = vector.load %arg2[%c1_68, %c0_69, %c0_70] : memref<2x8x40xf32, #tpu.memory_space<vmem>>, vector<1x8x40xf32>
    %68 = vector.shape_cast %67 : vector<1x8x40xf32> to vector<8x40xf32>
    %69 = vector.shape_cast %66 : vector<8x40xf32> to vector<1x8x40xf32>
    tpu.vector_store %arg2[%c1_68, %c0_69, %c0_70], %69 {strides = array<i32>} : memref<2x8x40xf32, #tpu.memory_space<vmem>>, vector<1x8x40xf32>,
    %cst_71 = arith.constant dense<0.000000e+00> : vector<8xf32>
    %70 = vector.multi_reduction <add>, %66, %cst_71 [1] : vector<8x40xf32> to vector<8xf32>
    %71 = vector.shape_cast %70 : vector<8xf32> to vector<8x1xf32>
    %72 = arith.addf %38, %71 : vector<8x1xf32>
    %73 = arith.mulf %66, %66 : vector<8x40xf32>
    %cst_72 = arith.constant dense<0.000000e+00> : vector<8xf32>
    %74 = vector.multi_reduction <add>, %73, %cst_72 [1] : vector<8x40xf32> to vector<8xf32>
    %75 = vector.shape_cast %74 : vector<8xf32> to vector<8x1xf32>
    %76 = arith.addf %42, %75 : vector<8x1xf32>
    %cst_73 = arith.constant 1.250000e-02 : f32
    %77 = vector.broadcast %cst_73 : f32 to vector<8x1xf32>
    %78 = arith.mulf %72, %77 : vector<8x1xf32>
    %cst_74 = arith.constant 1.250000e-02 : f32
    %79 = vector.broadcast %cst_74 : f32 to vector<8x1xf32>
    %80 = arith.mulf %76, %79 : vector<8x1xf32>
    %81 = arith.mulf %78, %78 : vector<8x1xf32>
    %82 = arith.subf %80, %81 : vector<8x1xf32>
    %cst_75 = arith.constant 9.99999974E-6 : f32
    %83 = vector.broadcast %cst_75 : f32 to vector<8x1xf32>
    %84 = arith.addf %82, %83 : vector<8x1xf32>
    %85 = math.rsqrt %84 : vector<8x1xf32>
    %86 = arith.mulf %2, %85 : vector<8x1xf32>
    %87 = arith.mulf %78, %86 : vector<8x1xf32>
    %88 = arith.subf %3, %87 : vector<8x1xf32>
    %c0_76 = arith.constant 0 : index
    %c0_77 = arith.constant 0 : index
    %c0_78 = arith.constant 0 : index
    %89 = vector.load %arg2[%c0_76, %c0_77, %c0_78] : memref<2x8x40xf32, #tpu.memory_space<vmem>>, vector<1x8x40xf32>
    %90 = vector.shape_cast %89 : vector<1x8x40xf32> to vector<8x40xf32>
    %91 = vector.broadcast %86 : vector<8x1xf32> to vector<8x40xf32>
    %92 = arith.mulf %90, %91 : vector<8x40xf32>
    %93 = vector.broadcast %88 : vector<8x1xf32> to vector<8x40xf32>
    %94 = arith.addf %92, %93 : vector<8x40xf32>
    %c0_79 = arith.constant 0 : index
    %c0_80 = arith.constant 0 : index
    %c0_81 = arith.constant 0 : index
    %95 = vector.load %arg2[%c0_79, %c0_80, %c0_81] : memref<2x8x40xf32, #tpu.memory_space<vmem>>, vector<1x8x40xf32>
    %96 = vector.shape_cast %95 : vector<1x8x40xf32> to vector<8x40xf32>
    %97 = vector.shape_cast %94 : vector<8x40xf32> to vector<1x8x40xf32>
    tpu.vector_store %arg2[%c0_79, %c0_80, %c0_81], %97 {strides = array<i32>} : memref<2x8x40xf32, #tpu.memory_space<vmem>>, vector<1x8x40xf32>,
    %c1_82 = arith.constant 1 : index
    %c0_83 = arith.constant 0 : index
    %c0_84 = arith.constant 0 : index
    %98 = vector.load %arg2[%c1_82, %c0_83, %c0_84] : memref<2x8x40xf32, #tpu.memory_space<vmem>>, vector<1x8x40xf32>
    %99 = vector.shape_cast %98 : vector<1x8x40xf32> to vector<8x40xf32>
    %100 = vector.broadcast %86 : vector<8x1xf32> to vector<8x40xf32>
    %101 = arith.mulf %99, %100 : vector<8x40xf32>
    %102 = vector.broadcast %88 : vector<8x1xf32> to vector<8x40xf32>
    %103 = arith.addf %101, %102 : vector<8x40xf32>
    %c1_85 = arith.constant 1 : index
    %c0_86 = arith.constant 0 : index
    %c0_87 = arith.constant 0 : index
    %104 = vector.load %arg2[%c1_85, %c0_86, %c0_87] : memref<2x8x40xf32, #tpu.memory_space<vmem>>, vector<1x8x40xf32>
    %105 = vector.shape_cast %104 : vector<1x8x40xf32> to vector<8x40xf32>
    %106 = vector.shape_cast %103 : vector<8x40xf32> to vector<1x8x40xf32>
    tpu.vector_store %arg2[%c1_85, %c0_86, %c0_87], %106 {strides = array<i32>} : memref<2x8x40xf32, #tpu.memory_space<vmem>>, vector<1x8x40xf32>,
    return
  }
}

</mosaic_0001>

<bundles_post_ra>
// kernel: tpu_custom_call.1
= control target key start
LH: loop header
LB: loop body
LE: loop exit
PB: predicated region body
PF: predicated region fallthrough
CT: control target
= control target key end

     0   :  { %7 = vsyncpa [#allocation4], 0  ;;  %s743_s0 = inlined_call_operand.hbm [shape: f32[2,8,40], index: 0, kind: input, shape index: {}]   ;;  %s744_s1 = inlined_call_operand.hbm [shape: f32[8,75], index: 1, kind: input, shape index: {}]   ;;  %s745_s2 = inlined_call_operand.hbm [shape: f32[2,8,40], index: 2, kind: output, shape index: {}]  }
   0x1   :  { %8 = vsyncpa [#allocation7], 0 }
   0x2   :  { %9 = vsyncpa [#allocation5], 0  ;;  %s629_s9 = smov [#allocation3]   ;;  %s557_s13 = scalar_lea.hbm %s743_s0, 256 }
   0x3   :  { %s15_s10 = sshll.u32 %s629_s9, 4  ;;  %p558_p0 = scmp.ne.s32.totalorder %s743_s0, %s557_s13  ;;  %s16_s10 = int_to_ptr.vmem [resolvable:$true] %s15_s10 }
   0x4   :  { %p561_p1 = scmp.lt.u32.totalorder %s557_s13, %s743_s0 }
   0x6   :  { %p563_p2 = pnand %p561_p1, %p558_p0 }
   0x8   :  { %566 = shalt.err (!%p563_p2)
}
   0x9   :  { %s567_s18 = scalar_lea.vmem %s16_s10, 256  ;;  %p572_p4 = scmp.lt.s32.totalorder %s16_s10, %s16_s10 }
   0xa   :  { %p568_p3 = scmp.ne.s32.totalorder %s16_s10, %s567_s18  ;;  %p573_p5 = scmp.lt.s32.totalorder %s567_s18, %s567_s18 }
   0xc   :  { %p574_p6 = por %p573_p5, %p572_p4 }
   0xe   :  { %p575_p7 = pnand %p574_p6, %p568_p3 }
  0x10   :  { %578 = shalt.err (!%p575_p7)
}
  0x11   :  { %s630_s19 = smov 128   ;;  %s631_s20 = smov 8  }
  0x12   :  { %21 = dma.hbm_to_vmem [thread:$0]  %s743_s0, 256, %s16_s10, [#allocation4], %s630_s19, %s630_s19, %s631_s20  }
  0x13   :  { %s632_s23 = smov [#allocation6]   ;;  %s579_s27 = scalar_lea.hbm %s744_s1, 128 }
  0x14   :  { %s28_s24 = sshll.u32 %s632_s23, 4  ;;  %p580_p8 = scmp.ne.s32.totalorder %s744_s1, %s579_s27  ;;  %s29_s24 = int_to_ptr.vmem [resolvable:$true] %s28_s24 }
  0x15   :  { %p583_p9 = scmp.lt.u32.totalorder %s579_s27, %s744_s1 }
  0x17   :  { %p585_p10 = pnand %p583_p9, %p580_p8 }
  0x19   :  { %588 = shalt.err (!%p585_p10)
}
  0x1a   :  { %s589_s4 = scalar_lea.vmem %s29_s24, 128  ;;  %p594_p12 = scmp.lt.s32.totalorder %s29_s24, %s29_s24 }
  0x1b   :  { %p590_p11 = scmp.ne.s32.totalorder %s29_s24, %s589_s4  ;;  %p595_p13 = scmp.lt.s32.totalorder %s589_s4, %s589_s4 }
  0x1d   :  { %p596_p0 = por %p595_p13, %p594_p12 }
  0x1f   :  { %p597_p1 = pnand %p596_p0, %p590_p11 }
  0x21   :  { %600 = shalt.err (!%p597_p1)
}
  0x22   :  { %31 = dma.hbm_to_vmem [thread:$0]  %s744_s1, 128, %s29_s24, [#allocation7]  }
  0x23   :  { %623 = dma.done.wait [#allocation4], 256  }
  0x24   :  { %624 = vsyncadd [#allocation4], 4294967040 }
  0x25   :  { %625 = dma.done.wait [#allocation7], 128  }
  0x26   :  { %626 = vsyncadd [#allocation7], 4294967168  ;;  %vm41_vm0 = vcmask 326656   ;;  %v39_v0 = vld [vmem:[#allocation3] sm:$0xff]  ;;  %v40_v1 = vld [vmem:[#allocation3 + $0x8] sm:$0xff]  ;;  %s633_s6 = smov 40  }
  0x27   :  { %46 = vrot.lane.b32.xlu0 %v39_v0, %s633_s6  ;;  %42 = vst.msk [vmem:[#allocation2] sm:$0xff] %vm41_vm0, %v39_v0  ;;  %43 = vst.msk [vmem:[#allocation2 + $0x8] sm:$0xff] %vm41_vm0, %v40_v1  ;;  %vm52_vm1 = vcmask 654656   ;;  %s634_s1 = smov 125   ;;  %s635_s7 = smov 127   ;;  %v642_v7 = vmov 0.0|0.0  }
  0x28   :  { %s636_s8 = smov 35   ;;  %s637_s9 = smov 126   ;;  %430 = vmatprep.subr.bf16.mxu0 %v642_v7  ;;  %442 = vmatprep.subr.bf16.mxu1 %v642_v7  ;;  %vm644_vm2 = vmmov 0   ;;  %v645_v35 = vmov 0.0   ;;  %v646_v38 = vmov 72   ;;  %v707_v41 = vld [vmem:[#allocation6] sm:$0xff] }
  0x29   :  { %s638_s10 = smov 33   ;;  %s639_s11 = smov 36   ;;  %406 = vmatprep.mubr.msk.f32.mxu0 %vm644_vm2, %v645_v35  ;;  %427 = vmatprep.mubr.msk.f32.mxu1 %vm644_vm2, %v645_v35  ;;  %vm105_vm3 = vcmask 588800  }
  0x2a   :  { %s640_s12 = smov 32   ;;  %s641_s13 = smov 34   ;;  %551 = vset.pattern.permute.xlu1 %v646_v38 }
  0x2b   :  { %48 = vrot.lane.b32.xlu0 %v40_v1, %s633_s6  ;;  %s643_s14 = smov 92   ;;  %s649_s15 = smov 1  }
  0x2c   :  { %s650_s16 = smov [#allocation8]  }
  0x2d   :  { %s353_s17 = sshll.u32 %s650_s16, 4  ;;  %s354_s17 = int_to_ptr.vmem [resolvable:$true] %s353_s17 }
  0x2e   :  { %s601_s18 = scalar_lea.vmem %s354_s17, 256  ;;  %p606_p3 = scmp.lt.s32.totalorder %s354_s17, %s354_s17 }
  0x2f   :  { %p602_p2 = scmp.ne.s32.totalorder %s354_s17, %s601_s18  ;;  %p607_p4 = scmp.lt.s32.totalorder %s601_s18, %s601_s18 }
  0x31   :  { %p608_p5 = por %p607_p4, %p606_p3 }
  0x33   :  { %p609_p6 = pnand %p608_p5, %p602_p2 }
  0x99   :  { %v47_v2 = vpop.permute.xlu0 %46 }
  0x9a   :  { %53 = vst.msk [vmem:[#allocation2] sm:$0xff] %vm52_vm1, %v47_v2 }
  0x9d   :  { %v49_v3 = vpop.permute.xlu0 %48 }
  0x9e   :  { %54 = vst.msk [vmem:[#allocation2 + $0x8] sm:$0xff] %vm52_vm1, %v49_v3 }
  0xa1   :  { %v55_v4 = vld [vmem:[#allocation2] sm:$0xff] }
  0xa5   :  { %v190_v5 = vld [vmem:[#allocation2 + $0x8] sm:$0xff] }
  0xa6   :  { %v486_v6 = vpack.i.bf16 %v190_v5, %v55_v4 }
  0xa8   :  { %487 = vrot.lane.b32.xlu0 %v486_v6, %s634_s1  ;;  %477 = vrot.lane.b32.xlu1 %v486_v6, %s635_s7 }
  0xac   :  { %497 = vrot.lane.b32.xlu0 %v486_v6, %s636_s8  ;;  %482 = vrot.lane.b32.xlu1 %v486_v6, %s637_s9 }
  0xb0   :  { %507 = vrot.lane.b32.xlu0 %v486_v6, %s638_s10  ;;  %492 = vrot.lane.b32.xlu1 %v486_v6, %s639_s11 }
  0xb4   :  { %206 = vrot.lane.b32.xlu0 %v190_v5, %s640_s12  ;;  %502 = vrot.lane.b32.xlu1 %v486_v6, %s641_s13 }
  0xb8   :  { %71 = vrot.lane.b32.xlu1 %v55_v4, %s640_s12 }
 0x11a   :  { %v488_v8 = vpop.permute.xlu0 %487  ;;  %v478_v9 = vpop.permute.xlu1 %477 }
 0x11b   :  { %v480_v10 = vunpack.i.h.bf16 %v478_v9  ;;  %v479_v11 = vunpack.i.l.bf16 %v478_v9  ;;  %v490_v16 = vunpack.i.h.bf16 %v488_v8  ;;  %v489_v17 = vunpack.i.l.bf16 %v488_v8 }
 0x11d   :  { %v516_v12 = vpack.i.bf16 %v480_v10, %v190_v5  ;;  %v511_v13 = vpack.i.bf16 %v479_v11, %v55_v4 }
 0x11e   :  { %v498_v14 = vpop.permute.xlu0 %497  ;;  %v483_v15 = vpop.permute.xlu1 %482 }
 0x11f   :  { %v485_v18 = vunpack.i.h.bf16 %v483_v15  ;;  %v484_v19 = vunpack.i.l.bf16 %v483_v15  ;;  %517 = vrot.lane.b32.xlu0 %v516_v12, %s643_s14  ;;  %512 = vrot.lane.b32.xlu1 %v511_v13, %s643_s14  ;;  %v500_v23 = vunpack.i.h.bf16 %v498_v14  ;;  %v499_v24 = vunpack.i.l.bf16 %v498_v14 }
 0x121   :  { %v526_v20 = vpack.i.bf16 %v490_v16, %v485_v18  ;;  %v521_v21 = vpack.i.bf16 %v489_v17, %v484_v19 }
 0x122   :  { %v493_v22 = vpop.permute.xlu1 %492  ;;  %v508_v25 = vpop.permute.xlu0 %507 }
 0x123   :  { %v495_v26 = vunpack.i.h.bf16 %v493_v22  ;;  %v494_v27 = vunpack.i.l.bf16 %v493_v22  ;;  %527 = vrot.lane.b32.xlu0 %v526_v20, %s643_s14  ;;  %522 = vrot.lane.b32.xlu1 %v521_v21, %s643_s14  ;;  %v510_v30 = vunpack.i.h.bf16 %v508_v25  ;;  %v509_v32 = vunpack.i.l.bf16 %v508_v25 }
 0x125   :  { %v536_v28 = vpack.i.bf16 %v500_v23, %v495_v26  ;;  %v531_v29 = vpack.i.bf16 %v499_v24, %v494_v27  ;;  %v647_v27 = vmov 73  }
 0x126   :  { %v503_v31 = vpop.permute.xlu1 %502  ;;  %v207_v39 = vpop.permute.xlu0 %206  ;;  %552 = vset.pattern.permute.xlu0 %v647_v27 }
 0x127   :  { %v505_v33 = vunpack.i.h.bf16 %v503_v31  ;;  %v504_v34 = vunpack.i.l.bf16 %v503_v31  ;;  %537 = vrot.lane.b32.xlu0 %v536_v28, %s643_s14  ;;  %532 = vrot.lane.b32.xlu1 %v531_v29, %s643_s14 }
 0x129   :  { %v546_v36 = vpack.i.bf16 %v510_v30, %v505_v33  ;;  %v541_v37 = vpack.i.bf16 %v509_v32, %v504_v34 }
 0x12a   :  { %v72_v40 = vpop.permute.xlu1 %71 }
 0x12b   :  { %547 = vrot.lane.b32.xlu0 %v546_v36, %s643_s14  ;;  %542 = vrot.lane.b32.xlu1 %v541_v37, %s643_s14 }
 0x12f   :  { %224 = vrot.lane.b32.xlu0 %v207_v39, %s643_s14  ;;  %94 = vrot.lane.b32.xlu1 %v72_v40, %s643_s14  ;;  %v648_v39 = vmov 74  }
 0x133   :  { %75 = vperm.xlu1 %551, %v707_v41  }
 0x137   :  { %553 = vset.pattern.permute.xlu1 %v648_v39 }
 0x191   :  { %v518_v42 = vpop.permute.xlu0 %517  ;;  %v513_v43 = vpop.permute.xlu1 %512 }
 0x192   :  { %v520_v44 = vunpack.i.h.bf16 %v518_v42  ;;  %v519_v45 = vunpack.i.l.bf16 %v518_v42  ;;  %v515_v46 = vunpack.i.h.bf16 %v513_v43  ;;  %v514_v47 = vunpack.i.l.bf16 %v513_v43 }
 0x194   :  { %v431_v48 = vpack.c.bf16 %v515_v46, %v514_v47  ;;  %v443_v49 = vpack.c.bf16 %v520_v44, %v519_v45 }
 0x195   :  { %v528_v50 = vpop.permute.xlu0 %527  ;;  %v523_v51 = vpop.permute.xlu1 %522 }
 0x196   :  { %v530_v52 = vunpack.i.h.bf16 %v528_v50  ;;  %v529_v53 = vunpack.i.l.bf16 %v528_v50  ;;  %v525_v54 = vunpack.i.h.bf16 %v523_v51  ;;  %v524_v55 = vunpack.i.l.bf16 %v523_v51  ;;  %432 = vmatpush3.bf16.msra.mxu0 %v431_v48  ;;  %444 = vmatpush3.bf16.msra.mxu1 %v443_v49 }
 0x197   :  { %445 = vmatprep.subr.bf16.mxu1 %v642_v7  ;;  %433 = vmatprep.subr.bf16.mxu0 %v642_v7 }
 0x198   :  { %v446_v56 = vpack.c.bf16 %v530_v52, %v529_v53  ;;  %v434_v57 = vpack.c.bf16 %v525_v54, %v524_v55 }
 0x199   :  { %v538_v58 = vpop.permute.xlu0 %537  ;;  %v533_v59 = vpop.permute.xlu1 %532 }
 0x19a   :  { %v540_v60 = vunpack.i.h.bf16 %v538_v58  ;;  %v539_v61 = vunpack.i.l.bf16 %v538_v58  ;;  %v535_v62 = vunpack.i.h.bf16 %v533_v59  ;;  %v534_v63 = vunpack.i.l.bf16 %v533_v59  ;;  %435 = vmatpush3.bf16.msra.mxu0 %v434_v57  ;;  %447 = vmatpush3.bf16.msra.mxu1 %v446_v56 }
 0x19b   :  { %448 = vmatprep.subr.bf16.mxu1 %v642_v7  ;;  %436 = vmatprep.subr.bf16.mxu0 %v642_v7 }
 0x19c   :  { %v449_v0 = vpack.c.bf16 %v540_v60, %v539_v61  ;;  %v437_v1 = vpack.c.bf16 %v535_v62, %v534_v63 }
 0x19d   :  { %v548_v2 = vpop.permute.xlu0 %547  ;;  %v543_v3 = vpop.permute.xlu1 %542 }
 0x19e   :  { %v550_v4 = vunpack.i.h.bf16 %v548_v2  ;;  %v549_v5 = vunpack.i.l.bf16 %v548_v2  ;;  %v545_v6 = vunpack.i.h.bf16 %v543_v3  ;;  %v544_v8 = vunpack.i.l.bf16 %v543_v3  ;;  %438 = vmatpush3.bf16.msra.mxu0 %v437_v1  ;;  %450 = vmatpush3.bf16.msra.mxu1 %v449_v0 }
 0x19f   :  { %451 = vmatprep.subr.bf16.mxu1 %v642_v7  ;;  %439 = vmatprep.subr.bf16.mxu0 %v642_v7 }
 0x1a0   :  { %v452_v9 = vpack.c.bf16 %v550_v4, %v549_v5  ;;  %v440_v10 = vpack.c.bf16 %v545_v6, %v544_v8 }
 0x1a1   :  { %v225_v11 = vpop.permute.xlu0 %224  ;;  %v95_v12 = vpop.permute.xlu1 %94 }
 0x1a2   :  { %441 = vmatpush3.bf16.msra.mxu0 %v440_v10  ;;  %453 = vmatpush3.bf16.msra.mxu1 %v452_v9 }
 0x1a3   :  { %404 = vmatprep.subr.mxu0 %v645_v35  ;;  %425 = vmatprep.subr.mxu1 %v645_v35 }
 0x1a6   :  { %405 = vmatpush3.msra.mxu0 %v95_v12  ;;  %426 = vmatpush3.msra.mxu1 %v225_v11 }
 0x1a7   :  { %407 = vmatmul.mubr.msk.f32.vlgmr.msra.gmra.mrb[0].mxu0 %vm105_vm3, %v707_v41  ;;  %428 = vmatmul.mubr.msk.f32.vlgmr.msra.gmra.mrb[0].mxu1 %vm105_vm3, %v707_v41 }
 0x1b2   :  { %v76_v13 = vpop.permute.xlu1 %75 }
 0x27a   :  { %v174_v14 = vpop.f32.mrb[0].mxu0  ;;  %v301_v15 = vpop.f32.mrb[0].mxu1 }
 0x27b   :  { %v175_v16 = vadd.f32 %v174_v14, %v76_v13  ;;  %v302_v7 = vadd.f32 %v301_v15, %v76_v13  ;;  %v408_v17 = vpop.f32.mrb[1].mxu0  ;;  %v429_v18 = vpop.f32.mrb[1].mxu1 }
 0x27d   :  { %v178_v19 = vmax.f32 %v175_v16, 0.0  ;;  %v305_v20 = vmax.f32 %v302_v7, 0.0 }
 0x27f   :  { %179 = vst.msk [vmem:[#allocation8] sm:$0xff] %vm41_vm0, %v178_v19  ;;  %307 = vst.msk [vmem:[#allocation8 + $0x8] sm:$0xff] %vm41_vm0, %v305_v20  ;;  %v308_v21 = vsel %vm41_vm0, %v305_v20, 0.0  ;;  %v180_v22 = vsel %vm41_vm0, %v178_v19, 0.0  ;;  %v184_v23 = vmul.f32 %v178_v19, %v178_v19  ;;  %v312_v25 = vmul.f32 %v305_v20, %v305_v20 }
 0x280   :  { %309 = vadd.xlane.f32.xlu1 %v308_v21  ;;  %181 = vadd.xlane.f32.xlu0 %v180_v22 }
 0x281   :  { %v185_v24 = vsel %vm41_vm0, %v184_v23, 0.0  ;;  %v313_v26 = vsel %vm41_vm0, %v312_v25, 0.0 }
 0x284   :  { %186 = vadd.xlane.f32.xlu0 %v185_v24 }
 0x286   :  { %v344_v47 = vld [vmem:[#allocation8 + $0x8] sm:$0xff]  ;;  %v330_v48 = vld [vmem:[#allocation8] sm:$0xff] }
 0x288   :  { %314 = vadd.xlane.f32.xlu0 %v313_v26 }
 0x30d   :  { %v310_v28 = vpop.xlane.xlu1 %309  ;;  %v182_v29 = vpop.xlane.xlu0 %181 }
 0x30e   :  { %v311_v30 = vadd.f32 %v310_v28, %v182_v29 }
 0x310   :  { %v317_v32 = vmul.f32 0.0125, %v311_v30 }
 0x311   :  { %v187_v31 = vpop.xlane.xlu0 %186 }
 0x312   :  { %v319_v35 = vmul.f32 %v317_v32, %v317_v32 }
 0x315   :  { %v315_v33 = vpop.xlane.xlu0 %314 }
 0x316   :  { %v316_v34 = vadd.f32 %v315_v33, %v187_v31 }
 0x318   :  { %v318_v36 = vmul.f32 0.0125, %v316_v34 }
 0x31a   :  { %v320_v37 = vsub.f32 %v318_v36, %v319_v35 }
 0x31c   :  { %v321_v38 = vadd.f32 1e-05, %v320_v37 }
 0x31e   :  { %555 = vrsqrt.f32 %v321_v38 }
 0x328   :  { %v556_v40 = vpop.eup %555 }
 0x329   :  { %v323_v42 = vmul.f32 %v556_v40, %v707_v41 }
 0x32b   :  { %333 = vperm.xlu0 %552, %v323_v42   ;;  %v324_v43 = vmul.f32 %v323_v42, %v317_v32 }
 0x32d   :  { %326 = vrot.lane.b32.xlu1 %v324_v43, %s649_s15 }
 0x32f   :  { %554 = vset.pattern.permute.xlu0 %v648_v39 }
 0x39f   :  { %v327_v44 = vpop.permute.xlu1 %326 }
 0x3a0   :  { %v329_v45 = vsub.f32 %v707_v41, %v327_v44 }
 0x3a2   :  { %339 = vperm.xlu1 %553, %v329_v45  }
 0x3aa   :  { %v334_v46 = vpop.permute.xlu0 %333 }
 0x3ab   :  { %v336_v49 = vmul.f32 %v334_v46, %v330_v48  ;;  %v345_v50 = vmul.f32 %v344_v47, %v334_v46 }
 0x421   :  { %v340_v51 = vpop.permute.xlu1 %339 }
 0x422   :  { %v342_v52 = vadd.f32 %v340_v51, %v336_v49  ;;  %v346_v53 = vadd.f32 %v345_v50, %v340_v51 }
 0x424   :  { %343 = vst.msk [vmem:[#allocation8] sm:$0xff] %vm41_vm0, %v342_v52  ;;  %347 = vst.msk [vmem:[#allocation8 + $0x8] sm:$0xff] %vm41_vm0, %v346_v53 }
 0x425   :  { %612 = shalt.err (!%p609_p6)
}
 0x426   :  { %s613_s23 = scalar_lea.hbm %s745_s2, 256 }
 0x427   :  { %p614_p7 = scmp.ne.s32.totalorder %s745_s2, %s613_s23  ;;  %p617_p8 = scmp.lt.u32.totalorder %s613_s23, %s745_s2 }
 0x429   :  { %p619_p9 = pnand %p617_p8, %p614_p7 }
 0x42b   :  { %622 = shalt.err (!%p619_p9)
}
 0x42c   :  { %359 = dma.vmem_to_hbm [thread:$0]  %s354_s17, 256, %s745_s2, [#allocation5], %s630_s19, %s630_s19, %s631_s20  }
 0x42d   :  { %627 = dma.done.wait [#allocation5], 256  }
 0x42e   :  { %628 = vsyncadd [#allocation5], 4294967040 }
 0x42f   :  { %363 = vsyncpa [#allocation4], 1 }
 0x430   :  { %364 = vsyncpa [#allocation7], 1 }
 0x431   :  { %365 = vsyncpa [#allocation5], 1 }

</bundles_post_ra>
